<compile_context>
chip_gen: v6e
topology: v6e:2x2x1
jax: 0.10.0
libtpu: 0.0.40
codegen_flags: <defaults>
</compile_context>

<pallas_src>
import math
from functools import partial

import jax
import jax.numpy as jnp
from jax import lax
from jax.experimental import pallas as pl
from jax.experimental.pallas import tpu as pltpu


# Contract last dim of x (K) with last dim of w (K); w is stored (out, in).
_DN = (((1,), (1,)), ((), ()))


def _fused_head_kernel(xv_ref, wv_ref, bv_ref, xt_ref, wt_ref, bt_ref,
                       ov_ref, ot_ref, acc_ref):
    k = pl.program_id(1)

    @pl.when(k == 0)
    def _init():
        # Fold the visual bias into the accumulator init (free vs. a separate
        # finalize-time add).
        acc_ref[...] = jnp.broadcast_to(bv_ref[...].astype(jnp.float32),
                                        acc_ref.shape)
        # Textual head: small K, computed in one shot on the first reduction
        # step; its output block stays resident in VMEM across the K loop and
        # its MXU work hides under the visual weight DMA stream.
        t = lax.dot_general(xt_ref[...], wt_ref[...], _DN,
                            preferred_element_type=jnp.float32)
        ot_ref[...] = (t + bt_ref[...].astype(jnp.float32)).astype(ot_ref.dtype)

    # Visual head: K-tiled accumulation on the MXU, f32 accumulator.
    acc_ref[...] += lax.dot_general(xv_ref[...], wv_ref[...], _DN,
                                    preferred_element_type=jnp.float32)

    @pl.when(k == pl.num_programs(1) - 1)
    def _finalize():
        ov_ref[...] = acc_ref[...].astype(ov_ref.dtype)


def _round_up(x, m):
    return ((x + m - 1) // m) * m


def _pad2d(x, rows, cols, dtype):
    x = x.astype(dtype)
    r, c = x.shape
    if r == rows and c == cols:
        return x
    return jnp.pad(x, ((0, rows - r), (0, cols - c)))


@partial(jax.jit, static_argnames=("tm_max", "tk_max", "vmem_limit_bytes"))
def fused_simple_head(visual_flat, w_visual, b_visual,
                      textual_flat, w_textual, b_textual,
                      *, tm_max=256, tk_max=4096,
                      vmem_limit_bytes=32 * 1024 * 1024):
    """Both SimpleHead linears in one pallas_call.

    visual_flat : (B, Kv)                      activations (cast to bf16)
    w_visual    : (N, Kv)  nn.Linear layout    (out_features, in_features)
    textual_flat: (B, Kt)
    w_textual   : (N, Kt)
    Returns (visual_embed, textual_embed), each (B, N) float32.
    """
    M, Kv = visual_flat.shape
    Mt, Kt = textual_flat.shape
    N, Kv_w = w_visual.shape
    Nt, Kt_w = w_textual.shape
    assert M == Mt and Kv == Kv_w and Kt == Kt_w and N == Nt

    # ---- tile sizes ---------------------------------------------------------
    # Batch: pad to the 8-sublane granule; "parallel" grid axis (v7x dual-TC).
    if _round_up(M, 8) <= tm_max:
        tm = _round_up(M, 8)
        M_pad = tm
    else:
        tm = tm_max
        M_pad = _round_up(M, tm)
    # Visual reduction axis: lane-dense 128-multiple tiles, as big as fits.
    if _round_up(Kv, 128) <= tk_max:
        tk = _round_up(Kv, 128)
        Kv_pad = tk
    else:
        tk = tk_max
        Kv_pad = _round_up(Kv, tk)
    Kt_pad = _round_up(Kt, 128)

    grid = (M_pad // tm, Kv_pad // tk)

    # ---- zero-pad to tile boundaries (zeros don't change the dot) ----------
    bf16 = jnp.bfloat16
    xv = _pad2d(visual_flat, M_pad, Kv_pad, bf16)
    xt = _pad2d(textual_flat, M_pad, Kt_pad, bf16)
    wv = _pad2d(w_visual, N, Kv_pad, bf16)
    wt = _pad2d(w_textual, N, Kt_pad, bf16)
    bv = b_visual.reshape(1, N).astype(jnp.float32)
    bt = b_textual.reshape(1, N).astype(jnp.float32)

    flops = 2 * M_pad * Kv_pad * N + 2 * M_pad * Kt_pad * N
    bytes_accessed = ((xv.size + xt.size + wv.size + wt.size) * 2
                      + (bv.size + bt.size) * 4
                      + 2 * M_pad * N * 4)

    out_shapes = (jax.ShapeDtypeStruct((M_pad, N), jnp.float32),
                  jax.ShapeDtypeStruct((M_pad, N), jnp.float32))

    visual_out, textual_out = pl.pallas_call(
        _fused_head_kernel,
        out_shape=out_shapes,
        grid_spec=pltpu.PrefetchScalarGridSpec(
            num_scalar_prefetch=0,
            grid=grid,
            in_specs=[
                pl.BlockSpec((tm, tk), lambda m, k: (m, k)),       # visual x
                pl.BlockSpec((N, tk), lambda m, k: (0, k)),        # visual W (out, in)
                pl.BlockSpec((1, N), lambda m, k: (0, 0)),         # visual b
                pl.BlockSpec((tm, Kt_pad), lambda m, k: (m, 0)),   # textual x
                pl.BlockSpec((N, Kt_pad), lambda m, k: (0, 0)),    # textual W
                pl.BlockSpec((1, N), lambda m, k: (0, 0)),         # textual b
            ],
            out_specs=[
                pl.BlockSpec((tm, N), lambda m, k: (m, 0)),        # visual out
                pl.BlockSpec((tm, N), lambda m, k: (m, 0)),        # textual out
            ],
            scratch_shapes=[pltpu.VMEM((tm, N), jnp.float32)],
        ),
        compiler_params=pltpu.CompilerParams(
            dimension_semantics=("parallel", "arbitrary"),
            vmem_limit_bytes=vmem_limit_bytes,
        ),
        cost_estimate=pl.CostEstimate(flops=flops, transcendentals=0,
                                      bytes_accessed=bytes_accessed),
    )(xv, wv, bv, xt, wt, bt)

    return visual_out[:M], textual_out[:M]


class SimpleHeadPallas:
    """Deterministic re-implementation of SimpleHead (eval forward only)."""

    def __init__(self, visual_size, textual_size, embed_size, key):
        self.embed_size = embed_size
        kv, kt = jax.random.split(key)
        # nn.init.kaiming_normal_(weight, a=0, mode='fan_out') on nn.Linear's
        # (out, in) weight -> fan_out = out_features = embed_size,
        # std = sqrt(2 / fan_out).  Bias is zero.
        std = math.sqrt(2.0 / embed_size)
        # Weights kept in the native (out_features, in_features) layout so the
        # big `in` axis lands on the 128-lane dim; stored bf16 for the
        # HBM-bound weight stream (kernel accumulates in f32).
        self.w_visual = (jax.random.normal(kv, (embed_size, visual_size),
                                           dtype=jnp.float32) * std).astype(jnp.bfloat16)
        self.w_textual = (jax.random.normal(kt, (embed_size, textual_size),
                                            dtype=jnp.float32) * std).astype(jnp.bfloat16)
        self.b_visual = jnp.zeros((embed_size,), jnp.float32)
        self.b_textual = jnp.zeros((embed_size,), jnp.float32)

    def forward(self, visual_feature, textual_feature, captions=None):
        batch = visual_feature.shape[0]
        visual_flat = visual_feature.reshape(batch, -1)
        textual_flat = textual_feature.reshape(batch, -1)
        visual_embed, textual_embed = fused_simple_head(
            visual_flat, self.w_visual, self.b_visual,
            textual_flat, self.w_textual, self.b_textual)
        # TODO(synk): training-branch loss_evaluator (make_loss_evaluator) is
        # config-dependent and not part of the eval forward; not implemented.
        return [visual_embed, textual_embed], None


if __name__ == "__main__":
    key = jax.random.PRNGKey(0)
    k_head, k_vis, k_txt = jax.random.split(key, 3)

    B, C, H, W = 2, 4, 16, 16          # visual feature, NCHW
    S, D = 8, 32                       # textual feature (B, S, D)
    embed_size = 32

    visual_size = C * H * W            # 1024
    textual_size = S * D               # 256

    visual_feature = jax.random.normal(k_vis, (B, C, H, W), dtype=jnp.float32)
    textual_feature = jax.random.normal(k_txt, (B, S, D), dtype=jnp.float32)

    head = SimpleHeadPallas(visual_size, textual_size, embed_size, k_head)
    outputs, losses = head.forward(visual_feature, textual_feature, captions=None)
    visual_embed, textual_embed = outputs
    jax.block_until_ready(visual_embed)
    jax.block_until_ready(textual_embed)

    # Correctness check against a plain JAX reference using the same bf16
    # inputs / f32 accumulation as the kernel.
    xv = visual_feature.reshape(B, -1).astype(jnp.bfloat16)
    xt = textual_feature.reshape(B, -1).astype(jnp.bfloat16)
    ref_v = jnp.dot(xv, head.w_visual.T,
                    preferred_element_type=jnp.float32) + head.b_visual
    ref_t = jnp.dot(xt, head.w_textual.T,
                    preferred_element_type=jnp.float32) + head.b_textual

    assert visual_embed.shape == (B, embed_size)
    assert textual_embed.shape == (B, embed_size)
    assert jnp.allclose(visual_embed, ref_v, atol=2e-2, rtol=2e-2)
    assert jnp.allclose(textual_embed, ref_t, atol=2e-2, rtol=2e-2)
    assert losses is None

    print("KERNEL_OK")
</pallas_src>

<mosaic_0001>
module attributes {stable_mosaic.version = 11 : i64} {
  func.func @_fused_head_kernel(%arg0: i32, %arg1: i32, %arg2: memref<8x1024xbf16, #tpu.memory_space<vmem>>, %arg3: memref<32x1024xbf16, #tpu.memory_space<vmem>>, %arg4: memref<1x32xf32, #tpu.memory_space<vmem>>, %arg5: memref<8x256xbf16, #tpu.memory_space<vmem>>, %arg6: memref<32x256xbf16, #tpu.memory_space<vmem>>, %arg7: memref<1x32xf32, #tpu.memory_space<vmem>>, %arg8: memref<8x32xf32, #tpu.memory_space<vmem>>, %arg9: memref<8x32xf32, #tpu.memory_space<vmem>>, %arg10: memref<8x32xf32, #tpu.memory_space<vmem>>) attributes {dimension_semantics = [#tpu.dimension_semantics<parallel>, #tpu.dimension_semantics<arbitrary>], iteration_bounds = array<i64: 1, 1>, scalar_prefetch = 0 : i64, scratch_operands = 1 : i64, tpu.core_type = #tpu.core_type<tc>, window_params = [{transform_indices = @transform_0, window_bounds = array<i64: 8, 1024>}, {transform_indices = @transform_1, window_bounds = array<i64: 32, 1024>}, {pipeline_mode = #tpu.pipeline_mode<synchronous>, transform_indices = @transform_2, window_bounds = array<i64: 1, 32>}, {transform_indices = @transform_3, window_bounds = array<i64: 8, 256>}, {pipeline_mode = #tpu.pipeline_mode<synchronous>, transform_indices = @transform_4, window_bounds = array<i64: 32, 256>}, {pipeline_mode = #tpu.pipeline_mode<synchronous>, transform_indices = @transform_5, window_bounds = array<i64: 1, 32>}, {transform_indices = @transform_6, window_bounds = array<i64: 8, 32>}, {transform_indices = @transform_7, window_bounds = array<i64: 8, 32>}]} {
    %c0_i32 = arith.constant 0 : i32
    %0 = arith.cmpi eq, %arg1, %c0_i32 : i32
    %1 = arith.extui %0 : i1 to i32
    %c0_i32_0 = arith.constant 0 : i32
    %2 = arith.cmpi ne, %1, %c0_i32_0 : i32
    scf.if %2 {
      %c0_10 = arith.constant 0 : index
      %c0_11 = arith.constant 0 : index
      %12 = vector.load %arg4[%c0_10, %c0_11] : memref<1x32xf32, #tpu.memory_space<vmem>>, vector<1x32xf32>
      %13 = vector.shape_cast %12 : vector<1x32xf32> to vector<1x32xf32>
      %14 = vector.broadcast %13 : vector<1x32xf32> to vector<8x32xf32>
      %c0_12 = arith.constant 0 : index
      %c0_13 = arith.constant 0 : index
      %15 = vector.load %arg10[%c0_12, %c0_13] : memref<8x32xf32, #tpu.memory_space<vmem>>, vector<8x32xf32>
      tpu.vector_store %arg10[%c0_12, %c0_13], %14 {strides = array<i32>} : memref<8x32xf32, #tpu.memory_space<vmem>>, vector<8x32xf32>,
      %c0_14 = arith.constant 0 : index
      %c0_15 = arith.constant 0 : index
      %16 = vector.load %arg5[%c0_14, %c0_15] : memref<8x256xbf16, #tpu.memory_space<vmem>>, vector<8x256xbf16>
      %c0_16 = arith.constant 0 : index
      %c0_17 = arith.constant 0 : index
      %17 = vector.load %arg6[%c0_16, %c0_17] : memref<32x256xbf16, #tpu.memory_space<vmem>>, vector<32x256xbf16>
      %cst_18 = arith.constant dense<0.000000e+00> : vector<8x32xf32>
      %18 = tpu.matmul %16, %17, %cst_18 {dimension_numbers = #tpu.dot_dimension_numbers<[1], [1], [0], [0], [0, 0, 1, 0], [], []>} : vector<8x256xbf16>, vector<32x256xbf16>, vector<8x32xf32> -> vector<8x32xf32>
      %c0_19 = arith.constant 0 : index
      %c0_20 = arith.constant 0 : index
      %19 = vector.load %arg7[%c0_19, %c0_20] : memref<1x32xf32, #tpu.memory_space<vmem>>, vector<1x32xf32>
      %20 = vector.broadcast %19 : vector<1x32xf32> to vector<8x32xf32>
      %21 = arith.addf %18, %20 : vector<8x32xf32>
      %c0_21 = arith.constant 0 : index
      %c0_22 = arith.constant 0 : index
      %22 = vector.load %arg9[%c0_21, %c0_22] : memref<8x32xf32, #tpu.memory_space<vmem>>, vector<8x32xf32>
      tpu.vector_store %arg9[%c0_21, %c0_22], %21 {strides = array<i32>} : memref<8x32xf32, #tpu.memory_space<vmem>>, vector<8x32xf32>,
    } else {
    }
    %c0 = arith.constant 0 : index
    %c0_1 = arith.constant 0 : index
    %3 = vector.load %arg10[%c0, %c0_1] : memref<8x32xf32, #tpu.memory_space<vmem>>, vector<8x32xf32>
    %c0_2 = arith.constant 0 : index
    %c0_3 = arith.constant 0 : index
    %4 = vector.load %arg2[%c0_2, %c0_3] : memref<8x1024xbf16, #tpu.memory_space<vmem>>, vector<8x1024xbf16>
    %c0_4 = arith.constant 0 : index
    %c0_5 = arith.constant 0 : index
    %5 = vector.load %arg3[%c0_4, %c0_5] : memref<32x1024xbf16, #tpu.memory_space<vmem>>, vector<32x1024xbf16>
    %cst = arith.constant dense<0.000000e+00> : vector<8x32xf32>
    %6 = tpu.matmul %4, %5, %cst {dimension_numbers = #tpu.dot_dimension_numbers<[1], [1], [0], [0], [0, 0, 1, 0], [], []>} : vector<8x1024xbf16>, vector<32x1024xbf16>, vector<8x32xf32> -> vector<8x32xf32>
    %7 = arith.addf %3, %6 : vector<8x32xf32>
    %c0_6 = arith.constant 0 : index
    %c0_7 = arith.constant 0 : index
    %8 = vector.load %arg10[%c0_6, %c0_7] : memref<8x32xf32, #tpu.memory_space<vmem>>, vector<8x32xf32>
    tpu.vector_store %arg10[%c0_6, %c0_7], %7 {strides = array<i32>} : memref<8x32xf32, #tpu.memory_space<vmem>>, vector<8x32xf32>,
    %c0_i32_8 = arith.constant 0 : i32
    %9 = arith.cmpi eq, %arg1, %c0_i32_8 : i32
    %10 = arith.extui %9 : i1 to i32
    %c0_i32_9 = arith.constant 0 : i32
    %11 = arith.cmpi ne, %10, %c0_i32_9 : i32
    scf.if %11 {
      %c0_10 = arith.constant 0 : index
      %c0_11 = arith.constant 0 : index
      %12 = vector.load %arg10[%c0_10, %c0_11] : memref<8x32xf32, #tpu.memory_space<vmem>>, vector<8x32xf32>
      %c0_12 = arith.constant 0 : index
      %c0_13 = arith.constant 0 : index
      %13 = vector.load %arg8[%c0_12, %c0_13] : memref<8x32xf32, #tpu.memory_space<vmem>>, vector<8x32xf32>
      tpu.vector_store %arg8[%c0_12, %c0_13], %12 {strides = array<i32>} : memref<8x32xf32, #tpu.memory_space<vmem>>, vector<8x32xf32>,
    } else {
    }
    return
  }
  func.func @transform_0(%arg0: i32, %arg1: i32) -> (i32, i32) {
    %c0_i32 = arith.constant 0 : i32
    return %arg0, %arg1 : i32, i32
  }
  func.func @transform_1(%arg0: i32, %arg1: i32) -> (i32, i32) {
    %c0_i32 = arith.constant 0 : i32
    %c0_i32_0 = arith.constant 0 : i32
    return %c0_i32, %arg1 : i32, i32
  }
  func.func @transform_2(%arg0: i32, %arg1: i32) -> (i32, i32) {
    %c0_i32 = arith.constant 0 : i32
    %c0_i32_0 = arith.constant 0 : i32
    %c0_i32_1 = arith.constant 0 : i32
    return %c0_i32, %c0_i32_0 : i32, i32
  }
  func.func @transform_3(%arg0: i32, %arg1: i32) -> (i32, i32) {
    %c0_i32 = arith.constant 0 : i32
    %c0_i32_0 = arith.constant 0 : i32
    return %arg0, %c0_i32 : i32, i32
  }
  func.func @transform_4(%arg0: i32, %arg1: i32) -> (i32, i32) {
    %c0_i32 = arith.constant 0 : i32
    %c0_i32_0 = arith.constant 0 : i32
    %c0_i32_1 = arith.constant 0 : i32
    return %c0_i32, %c0_i32_0 : i32, i32
  }
  func.func @transform_5(%arg0: i32, %arg1: i32) -> (i32, i32) {
    %c0_i32 = arith.constant 0 : i32
    %c0_i32_0 = arith.constant 0 : i32
    %c0_i32_1 = arith.constant 0 : i32
    return %c0_i32, %c0_i32_0 : i32, i32
  }
  func.func @transform_6(%arg0: i32, %arg1: i32) -> (i32, i32) {
    %c0_i32 = arith.constant 0 : i32
    %c0_i32_0 = arith.constant 0 : i32
    return %arg0, %c0_i32 : i32, i32
  }
  func.func @transform_7(%arg0: i32, %arg1: i32) -> (i32, i32) {
    %c0_i32 = arith.constant 0 : i32
    %c0_i32_0 = arith.constant 0 : i32
    return %arg0, %c0_i32 : i32, i32
  }
}

</mosaic_0001>

<bundles_post_ra>
// kernel: fused_simple_head.1
= control target key start
LH: loop header
LB: loop body
LE: loop exit
PB: predicated region body
PF: predicated region fallthrough
CT: control target
= control target key end

     0   :  { %13 = vsyncpa [#allocation4], 0  ;;  %s512_s24 = smov [#allocation3]   ;;  %s601_s0 = inlined_call_operand.vmem [shape: bf16[8,1024], index: 0, kind: input, shape index: {}]   ;;  %s602_s1 = inlined_call_operand.hbm [shape: bf16[32,1024], index: 1, kind: input, shape index: {}]   ;;  %s603_s2 = inlined_call_operand.vmem [shape: f32[1,32], index: 2, kind: input, shape index: {}]   ;;  %s604_s3 = inlined_call_operand.vmem [shape: bf16[8,256], index: 3, kind: input, shape index: {}]   ;;  %s605_s4 = inlined_call_operand.vmem [shape: bf16[32,256], index: 4, kind: input, shape index: {}]   ;;  %s606_s5 = inlined_call_operand.vmem [shape: f32[1,32], index: 5, kind: input, shape index: {}]   ;;  %s607_s6 = inlined_call_operand.vmem [shape: f32[8,32], index: 6, kind: output, shape index: {0}]   ;;  %s608_s7 = inlined_call_operand.vmem [shape: f32[8,32], index: 7, kind: output, shape index: {1}]  }
   0x1   :  { %s21_s25 = sshll.u32 %s512_s24, 4  ;;  %s22_s25 = int_to_ptr.vmem [resolvable:$true] %s21_s25 }
   0x2   :  { %s498_s26 = scalar_lea.vmem %s22_s25, 2048  ;;  %p503_p1 = scmp.lt.s32.totalorder %s22_s25, %s22_s25 }
   0x3   :  { %p499_p0 = scmp.ne.s32.totalorder %s22_s25, %s498_s26  ;;  %p504_p2 = scmp.lt.s32.totalorder %s498_s26, %s498_s26 }
   0x5   :  { %p505_p3 = por %p504_p2, %p503_p1 }
   0x7   :  { %p506_p4 = pnand %p505_p3, %p499_p0 }
   0x9   :  { %509 = shalt.err (!%p506_p4)
}
   0xa   :  { %s513_s27 = smov 512   ;;  %s514_s28 = smov 32  }
   0xb   :  { %27 = dma.hbm_to_vmem [thread:$0]  %s602_s1, 2048, %s22_s25, [#allocation4], %s513_s27, %s513_s27, %s514_s28  }
   0xc   :  { %510 = dma.done.wait [#allocation4], 2048  }
   0xd   :  { %511 = vsyncadd [#allocation4], 4294965248  ;;  %v474_v0 = vld [vmem:[%s605_s4 + $0x14] ss:$8 sps:$4 sm:$0xff]   ;;  %v476_v1 = vld [vmem:[%s605_s4 + $0x10] ss:$8 sps:$4 sm:$0xff]  }
   0xe   :  { %v146_v2 = vld [vmem:[#allocation3 + $0x40] sm:$0xff]  ;;  %104 = vmatprep.subr.bf16.mxu0 %v474_v0  ;;  %v53_v10 = vld [vmem:[%s604_s3] sm:$0xff]  ;;  %v147_v12 = vld [vmem:[#allocation3 + $0x48] sm:$0xff]  ;;  %vm51_vm0 = vcmask 261120  }
   0xf   :  { %v150_v3 = vld [vmem:[#allocation3 + $0x60] sm:$0xff]  ;;  %105 = vmatpush1.bf16.xpose.msra.mxu0 %v476_v1  ;;  %v442_v11 = vcombine.high %v53_v10, %v53_v10  ;;  %v151_v13 = vld [vmem:[#allocation3 + $0x68] sm:$0xff]  ;;  %v134_v14 = vld [vmem:[%s601_s0] sm:$0xff]  ;;  %v441_v26 = vcombine.low %v53_v10, %v53_v10 }
  0x10   :  { %v464_v4 = vcombine.high %v146_v2, %v150_v3  ;;  %v463_v5 = vcombine.low %v146_v2, %v150_v3  ;;  %v477_v6 = vld [vmem:[%s605_s4 + $0x4] ss:$8 sps:$4 sm:$0xff]   ;;  %v448_v15 = vcombine.high %v134_v14, %v134_v14  ;;  %v479_v16 = vld [vmem:[%s605_s4] ss:$8 sps:$4 sm:$0xff]   ;;  %v148_v17 = vld [vmem:[#allocation3 + $0x50] sm:$0xff]  ;;  %v466_v19 = vcombine.high %v147_v12, %v151_v13 }
  0x11   :  { %v138_v7 = vld [vmem:[#allocation3] sm:$0xff]  ;;  %106 = vmatprep.subr.bf16.mxu0 %v477_v6  ;;  %124 = vmatprep.mubr.bf16.mxu0 %v442_v11  ;;  %v152_v18 = vld [vmem:[#allocation3 + $0x70] sm:$0xff]  ;;  %v439_v21 = vld [vmem:[%s603_s2] ss:$0 sm:$0xff]  ;;  %v465_v28 = vcombine.low %v147_v12, %v151_v13  ;;  %v447_v32 = vcombine.low %v134_v14, %v134_v14 }
  0x12   :  { %v142_v8 = vld [vmem:[#allocation3 + $0x20] sm:$0xff]  ;;  %274 = vmatprep.subr.bf16.mxu1 %v464_v4  ;;  %294 = vmatprep.mubr.bf16.mxu1 %v448_v15  ;;  %v468_v22 = vcombine.high %v148_v17, %v152_v18  ;;  %52 = vst.msk [vmem:[#allocation2] sm:$0xff] %vm51_vm0, %v439_v21  ;;  %v139_v24 = vld [vmem:[#allocation3 + $0x8] sm:$0xff]  ;;  %v140_v29 = vld [vmem:[#allocation3 + $0x10] sm:$0xff]  ;;  %v467_v34 = vcombine.low %v148_v17, %v152_v18 }
  0x13   :  { %v456_v9 = vcombine.high %v138_v7, %v142_v8  ;;  %275 = vmatpush1.bf16.xpose.msra.mxu1 %v463_v5  ;;  %v455_v20 = vcombine.low %v138_v7, %v142_v8  ;;  %v135_v23 = vld [vmem:[%s601_s0 + $0x8] sm:$0xff]  ;;  %v143_v25 = vld [vmem:[#allocation3 + $0x28] sm:$0xff]  ;;  %v144_v30 = vld [vmem:[#allocation3 + $0x30] sm:$0xff] }
  0x14   :  { %v136_v27 = vld [vmem:[%s601_s0 + $0x10] sm:$0xff]  ;;  %v450_v31 = vcombine.high %v135_v23, %v135_v23  ;;  %v458_v33 = vcombine.high %v139_v24, %v143_v25  ;;  %v460_v36 = vcombine.high %v140_v29, %v144_v30  ;;  %v149_v37 = vld [vmem:[#allocation3 + $0x58] sm:$0xff]  ;;  %v457_v39 = vcombine.low %v139_v24, %v143_v25  ;;  %v137_v42 = vld [vmem:[%s601_s0 + $0x18] sm:$0xff] }
  0x15   :  { %276 = vmatprep.subr.bf16.mxu1 %v456_v9  ;;  %v452_v35 = vcombine.high %v136_v27, %v136_v27  ;;  %v153_v38 = vld [vmem:[#allocation3 + $0x78] sm:$0xff]  ;;  %v459_v41 = vcombine.low %v140_v29, %v144_v30  ;;  %v449_v45 = vcombine.low %v135_v23, %v135_v23  ;;  %v454_v47 = vcombine.high %v137_v42, %v137_v42 }
  0x16   :  { %v470_v40 = vcombine.high %v149_v37, %v153_v38  ;;  %v141_v43 = vld [vmem:[#allocation3 + $0x18] sm:$0xff]  ;;  %v469_v46 = vcombine.low %v149_v37, %v153_v38  ;;  %v451_v48 = vcombine.low %v136_v27, %v136_v27  ;;  %v453_v51 = vcombine.low %v137_v42, %v137_v42 }
  0x17   :  { %107 = vmatpush1.bf16.xpose.msra.mxu0 %v479_v16  ;;  %v145_v44 = vld [vmem:[#allocation3 + $0x38] sm:$0xff] }
  0x18   :  { %314 = vmatprep.subr.bf16.mxu0 %v466_v19  ;;  %v462_v49 = vcombine.high %v141_v43, %v145_v44  ;;  %v461_v50 = vcombine.low %v141_v43, %v145_v44  ;;  %v440_v52 = vld [vmem:[%s606_s5] ss:$0 sm:$0xff] }
  0x19   :  { %v133_v8 = vld [vmem:[#allocation2] sm:$0xff] }
  0x1b   :  { %277 = vmatpush1.bf16.xpose.msra.mxu1 %v455_v20 }
  0x1c   :  { %354 = vmatprep.subr.bf16.mxu1 %v468_v22 }
  0x1e   :  { %125 = vmatmul.mubr.bf16.vlgmr.msra.gmra.mxu0 %v441_v26 }
  0x1f   :  { %315 = vmatpush1.bf16.xpose.msra.mxu0 %v465_v28  ;;  %334 = vmatprep.mubr.bf16.mxu0 %v450_v31 }
  0x20   :  { %316 = vmatprep.subr.bf16.mxu0 %v458_v33 }
  0x22   :  { %295 = vmatmul.mubr.bf16.vlgmr.msra.gmra.mxu1 %v447_v32 }
  0x23   :  { %355 = vmatpush1.bf16.xpose.msra.mxu1 %v467_v34  ;;  %374 = vmatprep.mubr.bf16.mxu1 %v452_v35 }
  0x24   :  { %356 = vmatprep.subr.bf16.mxu1 %v460_v36 }
  0x27   :  { %317 = vmatpush1.bf16.xpose.msra.mxu0 %v457_v39 }
  0x28   :  { %394 = vmatprep.subr.bf16.mxu0 %v470_v40 }
  0x2b   :  { %357 = vmatpush1.bf16.xpose.msra.mxu1 %v459_v41 }
  0x2e   :  { %335 = vmatmul.mubr.bf16.vlgmr.msra.gmra.mxu0 %v449_v45 }
  0x2f   :  { %395 = vmatpush1.bf16.xpose.msra.mxu0 %v469_v46  ;;  %414 = vmatprep.mubr.bf16.mxu0 %v454_v47 }
  0x30   :  { %396 = vmatprep.subr.bf16.mxu0 %v462_v49 }
  0x32   :  { %375 = vmatmul.mubr.bf16.vlgmr.msra.gmra.mxu1 %v451_v48 }
  0x37   :  { %397 = vmatpush1.bf16.xpose.msra.mxu0 %v461_v50 }
  0x3e   :  { %415 = vmatmul.mubr.bf16.vlgmr.msra.gmra.mxu0 %v453_v51 }
  0xde   :  { %v126_v53 = vpop.f32.mrf.mxu0 }
  0xdf   :  { %v127_v54 = vadd.f32 %v440_v52, %v126_v53 }
  0xe0   :  { %v128_v55 = vpop.f32.mrf.mxu0 }
  0xe1   :  { %132 = vst.msk [vmem:[%s608_s7] sm:$0xff] %vm51_vm0, %v127_v54 }
  0xe2   :  { %v296_v56 = vpop.f32.mrf.mxu1  ;;  %v129_v57 = vpop.f32.mrf.mxu0 }
  0xe4   :  { %v298_v58 = vpop.f32.mrf.mxu1  ;;  %v130_v59 = vpop.f32.mrf.mxu0 }
  0xe6   :  { %v299_v60 = vpop.f32.mrf.mxu1 }
  0xe8   :  { %v300_v61 = vpop.f32.mrf.mxu1 }
  0xee   :  { %v336_v62 = vpop.f32.mrf.mxu0 }
  0xef   :  { %v337_v6 = vadd.f32 %v336_v62, %v296_v56 }
  0xf0   :  { %v338_v63 = vpop.f32.mrf.mxu0 }
  0xf2   :  { %v376_v0 = vpop.f32.mrf.mxu1  ;;  %v339_v1 = vpop.f32.mrf.mxu0 }
  0xf3   :  { %v377_v7 = vadd.f32 %v376_v0, %v337_v6 }
  0xf4   :  { %v378_v2 = vpop.f32.mrf.mxu1  ;;  %v340_v3 = vpop.f32.mrf.mxu0 }
  0xf6   :  { %v379_v4 = vpop.f32.mrf.mxu1 }
  0xf8   :  { %v380_v5 = vpop.f32.mrf.mxu1 }
  0xfe   :  { %v416_v9 = vpop.f32.mrf.mxu0 }
  0xff   :  { %v417_v10 = vadd.f32 %v416_v9, %v377_v7 }
 0x100   :  { %v418_v11 = vpop.f32.mrf.mxu0 }
 0x101   :  { %v422_v12 = vadd.f32 %v417_v10, %v133_v8 }
 0x102   :  { %v419_v13 = vpop.f32.mrf.mxu0 }
 0x103   :  { %424 = vst.msk [vmem:[#allocation2] sm:$0xff] %vm51_vm0, %v422_v12 }
 0x104   :  { %v420_v14 = vpop.f32.mrf.mxu0 }
 0x10a   :  { %v428_v15 = vld [vmem:[#allocation2] sm:$0xff] }
 0x10b   :  { %429 = vst.msk [vmem:[%s607_s6] sm:$0xff] %vm51_vm0, %v428_v15 }
 0x10c   :  { %438 = vsyncpa [#allocation4], 1 }

</bundles_post_ra>
